<compile_context>
chip_gen: v6e
topology: v6e:2x2x1
jax: 0.10.0
libtpu: 0.0.40
codegen_flags: <defaults>
</compile_context>

<pallas_src>
import math

import jax
import jax.numpy as jnp
from jax.experimental import pallas as pl
from jax.experimental.pallas import tpu as pltpu

LANES = 128
_SMALL_N_THRESHOLD = 64 * 1024  # below this, a fused jnp elementwise op wins


def _poly(params, x, y, z):
    """Pure-JAX Horner evaluation (small-N fast path & reference)."""
    a, b, c, d, e, f, g, h, i_, j = (params[k] for k in range(10))
    return (x * (a + x * (e + h * x))
            + y * (b + y * (f + i_ * y))
            + z * (c + z * (g + j * z))
            + d)


def ode1_kernel(params_ref, x_ref, y_ref, z_ref, out_ref):
    # params order: a, b, c, d, e, f, g, h, i, j  (matches the PyTorch module)
    a = params_ref[0]
    b = params_ref[1]
    c = params_ref[2]
    d = params_ref[3]
    e = params_ref[4]
    f = params_ref[5]
    g = params_ref[6]
    h = params_ref[7]
    i_ = params_ref[8]
    j = params_ref[9]

    x = x_ref[...]  # (tile_rows, LANES) f32
    y = y_ref[...]
    z = z_ref[...]

    # Horner form per variable: 9 vmuls total, fully hidden under the DMA stream.
    out_ref[...] = (
        x * (a + x * (e + h * x))
        + y * (b + y * (f + i_ * y))
        + z * (c + z * (g + j * z))
        + d
    )


def _round_up(v, m):
    return ((v + m - 1) // m) * m


def ode1_forward(params, x, y, z, *, max_tile_rows=2048, force_pallas=False):
    """params: (10,) f32; x, y, z: same shape, any length N. Returns Force with x's shape."""
    orig_shape = x.shape
    n = int(x.size)
    params = params.astype(jnp.float32)

    # Small-N fast path: XLA fuses this into one elementwise kernel with zero
    # extra copies — strictly faster than a pallas_call launch at tiny sizes.
    if n < _SMALL_N_THRESHOLD and not force_pallas:
        out = _poly(params,
                    x.reshape(-1).astype(jnp.float32),
                    y.reshape(-1).astype(jnp.float32),
                    z.reshape(-1).astype(jnp.float32))
        return out.reshape(orig_shape)

    rows_needed = pl.cdiv(n, LANES)

    # Tile selection: sublane-multiple of 8, capped at max_tile_rows, and capped
    # so the grid has >= 2 iterations when there is enough work (v7x has 2 TCs;
    # a length-1 grid would leave half its HBM bandwidth idle).
    tile_rows = _round_up(rows_needed, 8)
    if rows_needed > 8:
        tile_rows = min(tile_rows, _round_up(pl.cdiv(rows_needed, 2), 8))
    tile_rows = min(tile_rows, _round_up(int(max_tile_rows), 8))
    tile_rows = max(8, tile_rows)

    rows = _round_up(rows_needed, tile_rows)
    padded = rows * LANES
    grid = (rows // tile_rows,)

    def prep(v):
        v = v.reshape(-1).astype(jnp.float32)
        if padded != n:                       # no-pad fast path when aligned
            v = jnp.pad(v, (0, padded - n))
        return v.reshape(rows, LANES)

    xs, ys, zs = prep(x), prep(y), prep(z)

    def make_spec():
        return pl.BlockSpec((tile_rows, LANES), lambda i, params: (i, 0))

    out = pl.pallas_call(
        ode1_kernel,
        out_shape=jax.ShapeDtypeStruct((rows, LANES), jnp.float32),
        grid_spec=pltpu.PrefetchScalarGridSpec(
            num_scalar_prefetch=1,  # params -> SMEM, passed first to the kernel
            grid=grid,
            in_specs=[make_spec(), make_spec(), make_spec()],
            out_specs=pl.BlockSpec((tile_rows, LANES), lambda i, params: (i, 0)),
        ),
        compiler_params=pltpu.CompilerParams(
            dimension_semantics=("parallel",),
        ),
        cost_estimate=pl.CostEstimate(
            flops=18 * padded,            # 9 mul + 9 add per element (Horner)
            transcendentals=0,
            bytes_accessed=16 * padded,   # 3 f32 reads + 1 f32 write
        ),
    )(params, xs, ys, zs)

    out = out.reshape(-1)
    if padded != n:
        out = out[:n]  # padded tail lanes evaluate to the constant d; drop them
    return out.reshape(orig_shape)


if __name__ == "__main__":
    # Deterministic parameter init (stand-in for torch.randn(()) x 10).
    key = jax.random.PRNGKey(0)
    params = jax.random.normal(key, (10,), dtype=jnp.float32)
    a, b, c, d, e, f, g, h, i_, j = (params[k] for k in range(10))

    def expanded_ref(x, y, z):
        # Exactly the expanded form written in the PyTorch module's forward().
        return (a * x + e * x**2 + h * x**3
                + b * y + f * y**2 + i_ * y**3
                + c * z + g * z**2 + j * z**3 + d)

    # Inputs consistent with the module's script-level tensors (N = 100).
    N = 100
    x = jnp.linspace(-math.pi, math.pi, N, dtype=jnp.float32)
    y = jnp.linspace(-math.pi, math.pi, N, dtype=jnp.float32)
    z = jnp.linspace(-1.0, 1.0, N, dtype=jnp.float32)
    ref = expanded_ref(x, y, z)

    # 1) Natural path at module scale: small-N pure-jnp fallback.
    force_small = jax.block_until_ready(ode1_forward(params, x, y, z))
    assert force_small.shape == (N,)
    assert jnp.allclose(force_small, ref, rtol=1e-5, atol=1e-5)

    # 2) Force the Pallas kernel at the same small shape (single 8x128 tile).
    force_pallas = jax.block_until_ready(
        ode1_forward(params, x, y, z, force_pallas=True))
    assert force_pallas.shape == (N,)
    assert jnp.allclose(force_pallas, ref, rtol=1e-5, atol=1e-5)

    # 3) Aligned multi-tile run: exercises the no-pad fast path and grid of 2.
    N2 = 64 * 1024  # 512 rows x 128 lanes -> no padding, 2 tiles of 256 rows
    kx, ky, kz = jax.random.split(jax.random.PRNGKey(1), 3)
    x2 = jax.random.normal(kx, (N2,), dtype=jnp.float32)
    y2 = jax.random.normal(ky, (N2,), dtype=jnp.float32)
    z2 = jax.random.normal(kz, (N2,), dtype=jnp.float32)
    force2 = jax.block_until_ready(ode1_forward(params, x2, y2, z2))
    assert force2.shape == (N2,)
    assert jnp.allclose(force2, expanded_ref(x2, y2, z2), rtol=1e-4, atol=1e-4)

    print("KERNEL_OK")
</pallas_src>

<mosaic_0001>
module attributes {stable_mosaic.version = 11 : i64} {
  func.func @ode1_kernel(%arg0: i32, %arg1: memref<10xf32, #tpu.memory_space<smem>>, %arg2: memref<8x128xf32, #tpu.memory_space<vmem>>, %arg3: memref<8x128xf32, #tpu.memory_space<vmem>>, %arg4: memref<8x128xf32, #tpu.memory_space<vmem>>, %arg5: memref<8x128xf32, #tpu.memory_space<vmem>>) attributes {dimension_semantics = [#tpu.dimension_semantics<parallel>], iteration_bounds = array<i64: 1>, scalar_prefetch = 1 : i64, scratch_operands = 0 : i64, tpu.core_type = #tpu.core_type<tc>, window_params = [{transform_indices = @transform_0, window_bounds = array<i64: 8, 128>}, {transform_indices = @transform_1, window_bounds = array<i64: 8, 128>}, {transform_indices = @transform_2, window_bounds = array<i64: 8, 128>}, {transform_indices = @transform_3, window_bounds = array<i64: 8, 128>}]} {
    %c0 = arith.constant 0 : index
    %0 = memref.load %arg1[%c0] : memref<10xf32, #tpu.memory_space<smem>>
    %c1 = arith.constant 1 : index
    %1 = memref.load %arg1[%c1] : memref<10xf32, #tpu.memory_space<smem>>
    %c2 = arith.constant 2 : index
    %2 = memref.load %arg1[%c2] : memref<10xf32, #tpu.memory_space<smem>>
    %c3 = arith.constant 3 : index
    %3 = memref.load %arg1[%c3] : memref<10xf32, #tpu.memory_space<smem>>
    %c4 = arith.constant 4 : index
    %4 = memref.load %arg1[%c4] : memref<10xf32, #tpu.memory_space<smem>>
    %c5 = arith.constant 5 : index
    %5 = memref.load %arg1[%c5] : memref<10xf32, #tpu.memory_space<smem>>
    %c6 = arith.constant 6 : index
    %6 = memref.load %arg1[%c6] : memref<10xf32, #tpu.memory_space<smem>>
    %c7 = arith.constant 7 : index
    %7 = memref.load %arg1[%c7] : memref<10xf32, #tpu.memory_space<smem>>
    %c8 = arith.constant 8 : index
    %8 = memref.load %arg1[%c8] : memref<10xf32, #tpu.memory_space<smem>>
    %c9 = arith.constant 9 : index
    %9 = memref.load %arg1[%c9] : memref<10xf32, #tpu.memory_space<smem>>
    %c0_0 = arith.constant 0 : index
    %c0_1 = arith.constant 0 : index
    %10 = vector.load %arg2[%c0_0, %c0_1] : memref<8x128xf32, #tpu.memory_space<vmem>>, vector<8x128xf32>
    %c0_2 = arith.constant 0 : index
    %c0_3 = arith.constant 0 : index
    %11 = vector.load %arg3[%c0_2, %c0_3] : memref<8x128xf32, #tpu.memory_space<vmem>>, vector<8x128xf32>
    %c0_4 = arith.constant 0 : index
    %c0_5 = arith.constant 0 : index
    %12 = vector.load %arg4[%c0_4, %c0_5] : memref<8x128xf32, #tpu.memory_space<vmem>>, vector<8x128xf32>
    %13 = vector.broadcast %7 : f32 to vector<8x128xf32>
    %14 = arith.mulf %13, %10 : vector<8x128xf32>
    %15 = vector.broadcast %4 : f32 to vector<8x128xf32>
    %16 = arith.addf %15, %14 : vector<8x128xf32>
    %17 = arith.mulf %10, %16 : vector<8x128xf32>
    %18 = vector.broadcast %0 : f32 to vector<8x128xf32>
    %19 = arith.addf %18, %17 : vector<8x128xf32>
    %20 = arith.mulf %10, %19 : vector<8x128xf32>
    %21 = vector.broadcast %8 : f32 to vector<8x128xf32>
    %22 = arith.mulf %21, %11 : vector<8x128xf32>
    %23 = vector.broadcast %5 : f32 to vector<8x128xf32>
    %24 = arith.addf %23, %22 : vector<8x128xf32>
    %25 = arith.mulf %11, %24 : vector<8x128xf32>
    %26 = vector.broadcast %1 : f32 to vector<8x128xf32>
    %27 = arith.addf %26, %25 : vector<8x128xf32>
    %28 = arith.mulf %11, %27 : vector<8x128xf32>
    %29 = arith.addf %20, %28 : vector<8x128xf32>
    %30 = vector.broadcast %9 : f32 to vector<8x128xf32>
    %31 = arith.mulf %30, %12 : vector<8x128xf32>
    %32 = vector.broadcast %6 : f32 to vector<8x128xf32>
    %33 = arith.addf %32, %31 : vector<8x128xf32>
    %34 = arith.mulf %12, %33 : vector<8x128xf32>
    %35 = vector.broadcast %2 : f32 to vector<8x128xf32>
    %36 = arith.addf %35, %34 : vector<8x128xf32>
    %37 = arith.mulf %12, %36 : vector<8x128xf32>
    %38 = arith.addf %29, %37 : vector<8x128xf32>
    %39 = vector.broadcast %3 : f32 to vector<8x128xf32>
    %40 = arith.addf %38, %39 : vector<8x128xf32>
    %c0_6 = arith.constant 0 : index
    %c0_7 = arith.constant 0 : index
    %41 = vector.load %arg5[%c0_6, %c0_7] : memref<8x128xf32, #tpu.memory_space<vmem>>, vector<8x128xf32>
    tpu.vector_store %arg5[%c0_6, %c0_7], %40 {strides = array<i32>} : memref<8x128xf32, #tpu.memory_space<vmem>>, vector<8x128xf32>,
    return
  }
  func.func @transform_0(%arg0: i32, %arg1: memref<10xf32, #tpu.memory_space<smem>>) -> (i32, i32) {
    %c0_i32 = arith.constant 0 : i32
    %c0_i32_0 = arith.constant 0 : i32
    return %arg0, %c0_i32 : i32, i32
  }
  func.func @transform_1(%arg0: i32, %arg1: memref<10xf32, #tpu.memory_space<smem>>) -> (i32, i32) {
    %c0_i32 = arith.constant 0 : i32
    %c0_i32_0 = arith.constant 0 : i32
    return %arg0, %c0_i32 : i32, i32
  }
  func.func @transform_2(%arg0: i32, %arg1: memref<10xf32, #tpu.memory_space<smem>>) -> (i32, i32) {
    %c0_i32 = arith.constant 0 : i32
    %c0_i32_0 = arith.constant 0 : i32
    return %arg0, %c0_i32 : i32, i32
  }
  func.func @transform_3(%arg0: i32, %arg1: memref<10xf32, #tpu.memory_space<smem>>) -> (i32, i32) {
    %c0_i32 = arith.constant 0 : i32
    %c0_i32_0 = arith.constant 0 : i32
    return %arg0, %c0_i32 : i32, i32
  }
}

</mosaic_0001>

<bundles_post_ra>
// kernel: tpu_custom_call.1
= control target key start
LH: loop header
LB: loop body
LE: loop exit
PB: predicated region body
PF: predicated region fallthrough
CT: control target
= control target key end

     0   :  { %s223_s15 = smov [#allocation3]   ;;  %s271_s0 = inlined_call_operand.hbm [shape: f32[10], index: 0, kind: input, shape index: {}]   ;;  %s272_s1 = inlined_call_operand.hbm [shape: f32[8,128], index: 1, kind: input, shape index: {}]   ;;  %s273_s2 = inlined_call_operand.hbm [shape: f32[8,128], index: 2, kind: input, shape index: {}]   ;;  %s274_s3 = inlined_call_operand.hbm [shape: f32[8,128], index: 3, kind: input, shape index: {}]   ;;  %s275_s4 = inlined_call_operand.hbm [shape: f32[8,128], index: 4, kind: output, shape index: {}]  }
   0x1   :  { %10 = dma.hbm_to_smem %s271_s0, 16, %s223_s15, [#allocation2] }
   0x2   :  { %215 = dma.done.wait [#allocation2], 16 }
   0x3   :  { %216 = vsyncadd [#allocation2], 4294967280 }
   0x4   :  { %12 = sfence }
   0x5   :  { %13 = vsyncpa [#allocation5], 0 }
   0x6   :  { %14 = vsyncpa [#allocation8], 0 }
   0x7   :  { %15 = vsyncpa [#allocation6], 0  ;;  %s224_s18 = smov [#allocation7]   ;;  %s225_s20 = smov [#allocation4]  }
   0x8   :  { %s32_s19 = sshll.u32 %s224_s18, 4  ;;  %s22_s21 = sshll.u32 %s225_s20, 4  ;;  %s33_s19 = int_to_ptr.vmem [resolvable:$true] %s32_s19  ;;  %s23_s21 = int_to_ptr.vmem [resolvable:$true] %s22_s21 }
   0x9   :  { %s143_s22 = scalar_lea.vmem %s33_s19, 128  ;;  %p148_p1 = scmp.lt.s32.totalorder %s33_s19, %s33_s19 }
   0xa   :  { %p144_p0 = scmp.ne.s32.totalorder %s33_s19, %s143_s22  ;;  %p149_p2 = scmp.lt.s32.totalorder %s143_s22, %s143_s22 }
   0xc   :  { %p150_p3 = por %p149_p2, %p148_p1 }
   0xe   :  { %p151_p4 = pnand %p150_p3, %p144_p0 }
  0x10   :  { %154 = shalt.err (!%p151_p4)
}
  0x11   :  { %35 = dma.hbm_to_vmem [thread:$0]  %s273_s2, 128, %s33_s19, [#allocation8]  }
  0x12   :  { %s163_s24 = scalar_lea.vmem %s23_s21, 128  ;;  %p168_p6 = scmp.lt.s32.totalorder %s23_s21, %s23_s21 }
  0x13   :  { %p164_p5 = scmp.ne.s32.totalorder %s23_s21, %s163_s24  ;;  %p169_p7 = scmp.lt.s32.totalorder %s163_s24, %s163_s24 }
  0x15   :  { %p170_p8 = por %p169_p7, %p168_p6 }
  0x17   :  { %p171_p9 = pnand %p170_p8, %p164_p5 }
  0x19   :  { %174 = shalt.err (!%p171_p9)
}
  0x1a   :  { %25 = dma.hbm_to_vmem [thread:$0]  %s272_s1, 128, %s23_s21, [#allocation5]  }
  0x1b   :  { %s226_s27 = smov [#allocation9]  }
  0x1c   :  { %s42_s28 = sshll.u32 %s226_s27, 4  ;;  %s43_s28 = int_to_ptr.vmem [resolvable:$true] %s42_s28 }
  0x1d   :  { %s183_s29 = scalar_lea.vmem %s43_s28, 128  ;;  %p188_p11 = scmp.lt.s32.totalorder %s43_s28, %s43_s28 }
  0x1e   :  { %p184_p10 = scmp.ne.s32.totalorder %s43_s28, %s183_s29  ;;  %p189_p12 = scmp.lt.s32.totalorder %s183_s29, %s183_s29 }
  0x20   :  { %p190_p13 = por %p189_p12, %p188_p11 }
  0x22   :  { %p191_p0 = pnand %p190_p13, %p184_p10 }
  0x24   :  { %194 = shalt.err (!%p191_p0)
}
  0x25   :  { %45 = dma.hbm_to_vmem [thread:$0]  %s274_s3, 128, %s43_s28, [#allocation8]  }
  0x26   :  { %217 = dma.done.wait [#allocation5], 128  }
  0x27   :  { %218 = vsyncadd [#allocation5], 4294967168 }
  0x28   :  { %219 = dma.done.wait [#allocation8], 256  }
  0x29   :  { %220 = vsyncadd [#allocation8], 4294967040  ;;  %s265_s5 = sld [smem:[#allocation3]]  ;;  %v65_v0 = vld [vmem:[#allocation4] sm:$0xff]  ;;  %v66_v1 = vld [vmem:[#allocation7] sm:$0xff]  ;;  %s227_s13 = smov [#allocation10]  }
  0x2a   :  { %s116_s1 = sld [smem:[#allocation3 + $0x4]]  ;;  %v67_v2 = vld [vmem:[#allocation9] sm:$0xff]  ;;  %s103_s14 = sshll.u32 %s227_s13, 4  ;;  %s104_s14 = int_to_ptr.vmem [resolvable:$true] %s103_s14 }
  0x2b   :  { %s117_s6 = sld [smem:[#allocation3 + $0x5]]  ;;  %s195_s15 = scalar_lea.vmem %s104_s14, 128 }
  0x2c   :  { %s118_s7 = sld [smem:[#allocation3 + $0x6]]  ;;  %p196_p1 = scmp.ne.s32.totalorder %s104_s14, %s195_s15 }
  0x2d   :  { %s119_s8 = sld [smem:[#allocation3 + $0x7]]  ;;  %p200_p2 = scmp.lt.s32.totalorder %s104_s14, %s104_s14 }
  0x2e   :  { %s120_s9 = sld [smem:[#allocation3 + $0x8]]  ;;  %p201_p3 = scmp.lt.s32.totalorder %s195_s15, %s195_s15 }
  0x2f   :  { %s121_s10 = sld [smem:[#allocation3 + $0x9]]  ;;  %v73_v13 = vstv %s265_s5 }
  0x30   :  { %s113_s11 = sld [smem:[#allocation3 + $0x1]]  ;;  %v70_v4 = vstv %s116_s1  ;;  %p202_p4 = por %p201_p3, %p200_p2 }
  0x31   :  { %s114_s12 = sld [smem:[#allocation3 + $0x2]]  ;;  %v78_v7 = vstv %s117_s6 }
  0x32   :  { %v87_v10 = vstv %s118_s7  ;;  %s115_s3 = sld [smem:[#allocation3 + $0x3]]  ;;  %p203_p5 = pnand %p202_p4, %p196_p1 }
  0x33   :  { %v68_v3 = vstv %s119_s8 }
  0x34   :  { %v69_v5 = vmul.f32 %v68_v3, %v65_v0  ;;  %v76_v6 = vstv %s120_s9 }
  0x35   :  { %v77_v8 = vmul.f32 %v76_v6, %v66_v1  ;;  %v85_v9 = vstv %s121_s10 }
  0x36   :  { %v71_v11 = vadd.f32 %v70_v4, %v69_v5  ;;  %v86_v12 = vmul.f32 %v85_v9, %v67_v2  ;;  %v81_v16 = vstv %s113_s11 }
  0x37   :  { %v79_v14 = vadd.f32 %v78_v7, %v77_v8  ;;  %v90_v19 = vstv %s114_s12 }
  0x38   :  { %v72_v15 = vmul.f32 %v71_v11, %v65_v0  ;;  %v88_v17 = vadd.f32 %v87_v10, %v86_v12  ;;  %v94_v28 = vstv %s115_s3 }
  0x39   :  { %v80_v18 = vmul.f32 %v79_v14, %v66_v1 }
  0x3a   :  { %v74_v20 = vadd.f32 %v73_v13, %v72_v15  ;;  %v89_v21 = vmul.f32 %v88_v17, %v67_v2 }
  0x3b   :  { %v82_v22 = vadd.f32 %v81_v16, %v80_v18 }
  0x3c   :  { %v75_v23 = vmul.f32 %v74_v20, %v65_v0  ;;  %v91_v24 = vadd.f32 %v90_v19, %v89_v21 }
  0x3d   :  { %v83_v25 = vmul.f32 %v82_v22, %v66_v1 }
  0x3e   :  { %v92_v26 = vmul.f32 %v91_v24, %v67_v2 }
  0x3f   :  { %v84_v27 = vadd.f32 %v83_v25, %v75_v23 }
  0x41   :  { %v93_v29 = vadd.f32 %v92_v26, %v84_v27 }
  0x43   :  { %v95_v30 = vadd.f32 %v94_v28, %v93_v29 }
  0x45   :  { %96 = vst [vmem:[#allocation10] sm:$0xff] %v95_v30 }
  0x46   :  { %206 = shalt.err (!%p203_p5)
}
  0x47   :  { %106 = dma.vmem_to_hbm [thread:$0]  %s104_s14, 128, %s275_s4, [#allocation6]  }
  0x48   :  { %221 = dma.done.wait [#allocation6], 128  }
  0x49   :  { %222 = vsyncadd [#allocation6], 4294967168 }
  0x4a   :  { %110 = vsyncpa [#allocation5], 1 }
  0x4b   :  { %111 = vsyncpa [#allocation8], 1 }
  0x4c   :  { %112 = vsyncpa [#allocation6], 1 }

</bundles_post_ra>
